<compile_context>
chip_gen: v6e
topology: v6e:2x2x1
jax: 0.10.0
libtpu: 0.0.40
codegen_flags: <defaults>
</compile_context>

<pallas_src>
import jax
import jax.numpy as jnp
from jax.experimental import pallas as pl
from jax.experimental.pallas import tpu as pltpu


def _cbow_kernel(ctx_idx_ref, tgt_idx_ref, neg_idx_ref,   # VMEM int32 index blocks
                 ctx_tab_ref, tgt_tab_ref,                # VMEM (V, E) tables
                 loss_ref):                               # VMEM (1, 1) output
    B, C = ctx_idx_ref.shape
    K = neg_idx_ref.shape[1]
    V, _ = ctx_tab_ref.shape

    # Lane index grid over the vocabulary: iota_v[b, v] = v.
    iota_v = jax.lax.broadcasted_iota(jnp.int32, (B, V), 1)

    # ---- context COUNT matrix -> v_c_mean via MXU matmul ----
    ctx_counts = (iota_v == ctx_idx_ref[:, 0:1]).astype(jnp.float32)
    for c in range(1, C):
        ctx_counts = ctx_counts + (iota_v == ctx_idx_ref[:, c:c + 1]).astype(jnp.float32)
    ctx_counts = ctx_counts * (1.0 / C)                                   # (B, V)
    v_c_mean = jnp.dot(ctx_counts, ctx_tab_ref[...],
                       preferred_element_type=jnp.float32)                # (B, E)

    # ---- all pos/neg scores in one MXU contraction (contract E vs E) ----
    scores = jax.lax.dot_general(v_c_mean, tgt_tab_ref[...],
                                 dimension_numbers=(((1,), (1,)), ((), ())),
                                 preferred_element_type=jnp.float32)      # (B, V)

    # ---- masks: target one-hot; negatives COUNT matrix (duplicates weighted) ----
    m_pos = (iota_v == tgt_idx_ref[...]).astype(jnp.float32)              # (B, V)
    m_neg = (iota_v == neg_idx_ref[:, 0:1]).astype(jnp.float32)
    for k in range(1, K):
        m_neg = m_neg + (iota_v == neg_idx_ref[:, k:k + 1]).astype(jnp.float32)

    # ---- masked softplus reduction; softplus(-x) = softplus(x) - x ----
    sp = jnp.maximum(scores, 0.0) + jnp.log(1.0 + jnp.exp(-jnp.abs(scores)))
    total = jnp.sum(m_pos * (sp - scores) + m_neg * sp, keepdims=True)    # (1, 1)
    loss_ref[...] = total * (1.0 / B)                                     # single write


def cbow_loss(context_table, target_table, contexts, targets, negatives):
    V, E = context_table.shape
    B, C = contexts.shape
    K = negatives.shape[1]

    ctx_idx = contexts.astype(jnp.int32)                # (B, C)
    tgt_idx = targets.reshape(B, 1).astype(jnp.int32)   # (B, 1)
    neg_idx = negatives.astype(jnp.int32)               # (B, K)

    vmem = lambda: pl.BlockSpec(memory_space=pltpu.MemorySpace.VMEM)

    out = pl.pallas_call(
        _cbow_kernel,
        out_shape=jax.ShapeDtypeStruct((1, 1), jnp.float32),
        in_specs=[vmem(), vmem(), vmem(), vmem(), vmem()],
        out_specs=vmem(),
    )(ctx_idx, tgt_idx, neg_idx,
      context_table.astype(jnp.float32), target_table.astype(jnp.float32))
    return out[0, 0]


def cbow_loss_ref(context_table, target_table, contexts, targets, negatives):
    # Pure-JAX reference matching the PyTorch CBOW.forward exactly.
    v_c = context_table[contexts]                     # (B, C, E)
    v_c_mean = v_c.mean(axis=1)                       # (B, E)
    v_t = target_table[targets]                       # (B, E)
    v_n = target_table[negatives]                     # (B, K, E)
    pos_score = jnp.sum(v_c_mean * v_t, axis=1)                   # (B,)
    neg_score = jnp.einsum("bke,be->bk", v_n, v_c_mean)           # (B, K) == bmm+squeeze
    return (-jnp.log(jax.nn.sigmoid(pos_score)).mean()
            - jnp.log(jax.nn.sigmoid(-neg_score)).sum(1).mean())


if __name__ == "__main__":
    vocab_size, emb_size = 256, 128
    B, C, K = 8, 4, 5

    key = jax.random.PRNGKey(0)
    k1, k2, k3, k4, k5 = jax.random.split(key, 5)

    # xavier_uniform_ on (vocab_size, emb_size): bound = sqrt(6 / (fan_in + fan_out))
    bound = (6.0 / (vocab_size + emb_size)) ** 0.5
    context_table = jax.random.uniform(
        k1, (vocab_size, emb_size), jnp.float32, -bound, bound)
    target_table = jax.random.uniform(
        k2, (vocab_size, emb_size), jnp.float32, -bound, bound)

    contexts = jax.random.randint(k3, (B, C), 0, vocab_size, dtype=jnp.int32)
    targets = jax.random.randint(k4, (B,), 0, vocab_size, dtype=jnp.int32)
    negatives = jax.random.randint(k5, (B, K), 0, vocab_size, dtype=jnp.int32)

    loss = jax.block_until_ready(
        cbow_loss(context_table, target_table, contexts, targets, negatives))
    ref = cbow_loss_ref(context_table, target_table, contexts, targets, negatives)
    assert jnp.allclose(loss, ref, rtol=1e-4, atol=1e-4), (loss, ref)
    print("KERNEL_OK")
</pallas_src>

<mosaic_0001>
module attributes {stable_mosaic.version = 11 : i64} {
  func.func @_cbow_kernel(%arg0: memref<8x4xi32, #tpu.memory_space<vmem>>, %arg1: memref<8x1xi32, #tpu.memory_space<vmem>>, %arg2: memref<8x5xi32, #tpu.memory_space<vmem>>, %arg3: memref<256x128xf32, #tpu.memory_space<vmem>>, %arg4: memref<256x128xf32, #tpu.memory_space<vmem>>, %arg5: memref<1x1xf32, #tpu.memory_space<vmem>>) attributes {dimension_semantics = [], scalar_prefetch = 0 : i64, scratch_operands = 0 : i64, tpu.core_type = #tpu.core_type<tc>} {
    %0 = tpu.iota {dimensions = array<i32: 1>} : vector<8x256xi32>
    %c0 = arith.constant 0 : index
    %c0_0 = arith.constant 0 : index
    %1 = vector.load %arg0[%c0, %c0_0] : memref<8x4xi32, #tpu.memory_space<vmem>>, vector<8x1xi32>
    %2 = vector.broadcast %1 : vector<8x1xi32> to vector<8x256xi32>
    %3 = arith.cmpi eq, %0, %2 : vector<8x256xi32>
    %4 = arith.extui %3 : vector<8x256xi1> to vector<8x256xi32>
    %5 = arith.sitofp %4 : vector<8x256xi32> to vector<8x256xf32>
    %c0_1 = arith.constant 0 : index
    %c1 = arith.constant 1 : index
    %6 = vector.load %arg0[%c0_1, %c1] : memref<8x4xi32, #tpu.memory_space<vmem>>, vector<8x1xi32>
    %7 = vector.broadcast %6 : vector<8x1xi32> to vector<8x256xi32>
    %8 = arith.cmpi eq, %0, %7 : vector<8x256xi32>
    %9 = arith.extui %8 : vector<8x256xi1> to vector<8x256xi32>
    %10 = arith.sitofp %9 : vector<8x256xi32> to vector<8x256xf32>
    %11 = arith.addf %5, %10 : vector<8x256xf32>
    %c0_2 = arith.constant 0 : index
    %c2 = arith.constant 2 : index
    %12 = vector.load %arg0[%c0_2, %c2] : memref<8x4xi32, #tpu.memory_space<vmem>>, vector<8x1xi32>
    %13 = vector.broadcast %12 : vector<8x1xi32> to vector<8x256xi32>
    %14 = arith.cmpi eq, %0, %13 : vector<8x256xi32>
    %15 = arith.extui %14 : vector<8x256xi1> to vector<8x256xi32>
    %16 = arith.sitofp %15 : vector<8x256xi32> to vector<8x256xf32>
    %17 = arith.addf %11, %16 : vector<8x256xf32>
    %c0_3 = arith.constant 0 : index
    %c3 = arith.constant 3 : index
    %18 = vector.load %arg0[%c0_3, %c3] : memref<8x4xi32, #tpu.memory_space<vmem>>, vector<8x1xi32>
    %19 = vector.broadcast %18 : vector<8x1xi32> to vector<8x256xi32>
    %20 = arith.cmpi eq, %0, %19 : vector<8x256xi32>
    %21 = arith.extui %20 : vector<8x256xi1> to vector<8x256xi32>
    %22 = arith.sitofp %21 : vector<8x256xi32> to vector<8x256xf32>
    %23 = arith.addf %17, %22 : vector<8x256xf32>
    %cst = arith.constant 2.500000e-01 : f32
    %24 = vector.broadcast %cst : f32 to vector<8x256xf32>
    %25 = arith.mulf %23, %24 : vector<8x256xf32>
    %c0_4 = arith.constant 0 : index
    %c0_5 = arith.constant 0 : index
    %26 = vector.load %arg3[%c0_4, %c0_5] : memref<256x128xf32, #tpu.memory_space<vmem>>, vector<256x128xf32>
    %cst_6 = arith.constant dense<0.000000e+00> : vector<8x128xf32>
    %27 = tpu.matmul %25, %26, %cst_6 {dimension_numbers = #tpu.dot_dimension_numbers<[1], [0], [0], [1], [0, 0, 1, 1], [], []>} : vector<8x256xf32>, vector<256x128xf32>, vector<8x128xf32> -> vector<8x128xf32>
    %c0_7 = arith.constant 0 : index
    %c0_8 = arith.constant 0 : index
    %28 = vector.load %arg4[%c0_7, %c0_8] : memref<256x128xf32, #tpu.memory_space<vmem>>, vector<256x128xf32>
    %cst_9 = arith.constant dense<0.000000e+00> : vector<8x256xf32>
    %29 = tpu.matmul %27, %28, %cst_9 {dimension_numbers = #tpu.dot_dimension_numbers<[1], [1], [0], [0], [0, 0, 1, 0], [], []>} : vector<8x128xf32>, vector<256x128xf32>, vector<8x256xf32> -> vector<8x256xf32>
    %c0_10 = arith.constant 0 : index
    %c0_11 = arith.constant 0 : index
    %30 = vector.load %arg1[%c0_10, %c0_11] : memref<8x1xi32, #tpu.memory_space<vmem>>, vector<8x1xi32>
    %31 = vector.broadcast %30 : vector<8x1xi32> to vector<8x256xi32>
    %32 = arith.cmpi eq, %0, %31 : vector<8x256xi32>
    %33 = arith.extui %32 : vector<8x256xi1> to vector<8x256xi32>
    %34 = arith.sitofp %33 : vector<8x256xi32> to vector<8x256xf32>
    %c0_12 = arith.constant 0 : index
    %c0_13 = arith.constant 0 : index
    %35 = vector.load %arg2[%c0_12, %c0_13] : memref<8x5xi32, #tpu.memory_space<vmem>>, vector<8x1xi32>
    %36 = vector.broadcast %35 : vector<8x1xi32> to vector<8x256xi32>
    %37 = arith.cmpi eq, %0, %36 : vector<8x256xi32>
    %38 = arith.extui %37 : vector<8x256xi1> to vector<8x256xi32>
    %39 = arith.sitofp %38 : vector<8x256xi32> to vector<8x256xf32>
    %c0_14 = arith.constant 0 : index
    %c1_15 = arith.constant 1 : index
    %40 = vector.load %arg2[%c0_14, %c1_15] : memref<8x5xi32, #tpu.memory_space<vmem>>, vector<8x1xi32>
    %41 = vector.broadcast %40 : vector<8x1xi32> to vector<8x256xi32>
    %42 = arith.cmpi eq, %0, %41 : vector<8x256xi32>
    %43 = arith.extui %42 : vector<8x256xi1> to vector<8x256xi32>
    %44 = arith.sitofp %43 : vector<8x256xi32> to vector<8x256xf32>
    %45 = arith.addf %39, %44 : vector<8x256xf32>
    %c0_16 = arith.constant 0 : index
    %c2_17 = arith.constant 2 : index
    %46 = vector.load %arg2[%c0_16, %c2_17] : memref<8x5xi32, #tpu.memory_space<vmem>>, vector<8x1xi32>
    %47 = vector.broadcast %46 : vector<8x1xi32> to vector<8x256xi32>
    %48 = arith.cmpi eq, %0, %47 : vector<8x256xi32>
    %49 = arith.extui %48 : vector<8x256xi1> to vector<8x256xi32>
    %50 = arith.sitofp %49 : vector<8x256xi32> to vector<8x256xf32>
    %51 = arith.addf %45, %50 : vector<8x256xf32>
    %c0_18 = arith.constant 0 : index
    %c3_19 = arith.constant 3 : index
    %52 = vector.load %arg2[%c0_18, %c3_19] : memref<8x5xi32, #tpu.memory_space<vmem>>, vector<8x1xi32>
    %53 = vector.broadcast %52 : vector<8x1xi32> to vector<8x256xi32>
    %54 = arith.cmpi eq, %0, %53 : vector<8x256xi32>
    %55 = arith.extui %54 : vector<8x256xi1> to vector<8x256xi32>
    %56 = arith.sitofp %55 : vector<8x256xi32> to vector<8x256xf32>
    %57 = arith.addf %51, %56 : vector<8x256xf32>
    %c0_20 = arith.constant 0 : index
    %c4 = arith.constant 4 : index
    %58 = vector.load %arg2[%c0_20, %c4] : memref<8x5xi32, #tpu.memory_space<vmem>>, vector<8x1xi32>
    %59 = vector.broadcast %58 : vector<8x1xi32> to vector<8x256xi32>
    %60 = arith.cmpi eq, %0, %59 : vector<8x256xi32>
    %61 = arith.extui %60 : vector<8x256xi1> to vector<8x256xi32>
    %62 = arith.sitofp %61 : vector<8x256xi32> to vector<8x256xf32>
    %63 = arith.addf %57, %62 : vector<8x256xf32>
    %cst_21 = arith.constant 0.000000e+00 : f32
    %64 = vector.broadcast %cst_21 : f32 to vector<8x256xf32>
    %65 = arith.maximumf %29, %64 : vector<8x256xf32>
    %66 = math.absf %29 : vector<8x256xf32>
    %cst_22 = arith.constant 0.000000e+00 : f32
    %67 = vector.broadcast %cst_22 : f32 to vector<8x256xf32>
    %68 = arith.subf %67, %66 : vector<8x256xf32>
    %69 = math.exp %68 : vector<8x256xf32>
    %cst_23 = arith.constant 1.000000e+00 : f32
    %70 = vector.broadcast %cst_23 : f32 to vector<8x256xf32>
    %71 = arith.addf %70, %69 : vector<8x256xf32>
    %72 = math.log %71 : vector<8x256xf32>
    %73 = arith.addf %65, %72 : vector<8x256xf32>
    %74 = arith.subf %73, %29 : vector<8x256xf32>
    %75 = arith.mulf %34, %74 : vector<8x256xf32>
    %76 = arith.mulf %63, %73 : vector<8x256xf32>
    %77 = arith.addf %75, %76 : vector<8x256xf32>
    %78 = vector.shape_cast %77 : vector<8x256xf32> to vector<1x8x256xf32>
    %cst_24 = arith.constant dense<0.000000e+00> : vector<1xf32>
    %79 = vector.multi_reduction <add>, %78, %cst_24 [1, 2] : vector<1x8x256xf32> to vector<1xf32>
    %80 = vector.shape_cast %79 : vector<1xf32> to vector<1x1x1xf32>
    %81 = vector.extract %80[0, 0, 0] : f32 from vector<1x1x1xf32>
    %82 = vector.broadcast %81 : f32 to vector<1x1xf32>
    %cst_25 = arith.constant 1.250000e-01 : f32
    %83 = vector.broadcast %cst_25 : f32 to vector<1x1xf32>
    %84 = arith.mulf %82, %83 : vector<1x1xf32>
    %c0_26 = arith.constant 0 : index
    %c0_27 = arith.constant 0 : index
    %85 = vector.load %arg5[%c0_26, %c0_27] : memref<1x1xf32, #tpu.memory_space<vmem>>, vector<1x1xf32>
    tpu.vector_store %arg5[%c0_26, %c0_27], %84 {strides = array<i32>} : memref<1x1xf32, #tpu.memory_space<vmem>>, vector<1x1xf32>,
    return
  }
}

</mosaic_0001>

<bundles_post_ra>
// kernel: tpu_custom_call.1
= control target key start
LH: loop header
LB: loop body
LE: loop exit
PB: predicated region body
PF: predicated region fallthrough
CT: control target
= control target key end

     0   :  { %10 = vsyncpa [#allocation3], 0  ;;  %s725_s0 = inlined_call_operand.vmem [shape: s32[8,4], index: 0, kind: input, shape index: {}]   ;;  %s726_s1 = inlined_call_operand.vmem [shape: s32[8,1], index: 1, kind: input, shape index: {}]   ;;  %s727_s2 = inlined_call_operand.vmem [shape: s32[8,5], index: 2, kind: input, shape index: {}]   ;;  %s728_s3 = inlined_call_operand.hbm [shape: f32[256,128], index: 3, kind: input, shape index: {}]   ;;  %s729_s4 = inlined_call_operand.hbm [shape: f32[256,128], index: 4, kind: input, shape index: {}]   ;;  %s730_s5 = inlined_call_operand.hbm [shape: f32[1,1], index: 5, kind: output, shape index: {}]  }
   0x1   :  { %11 = vsyncpa [#allocation6], 0 }
   0x2   :  { %12 = vsyncpa [#allocation4], 0  ;;  %s608_s18 = smov [#allocation2]  }
   0x3   :  { %s24_s19 = sshll.u32 %s608_s18, 4  ;;  %s25_s19 = int_to_ptr.vmem [resolvable:$true] %s24_s19 }
   0x4   :  { %s550_s20 = scalar_lea.vmem %s25_s19, 4096  ;;  %p555_p1 = scmp.lt.s32.totalorder %s25_s19, %s25_s19 }
   0x5   :  { %p551_p0 = scmp.ne.s32.totalorder %s25_s19, %s550_s20  ;;  %p556_p2 = scmp.lt.s32.totalorder %s550_s20, %s550_s20 }
   0x7   :  { %p557_p3 = por %p556_p2, %p555_p1 }
   0x9   :  { %p558_p4 = pnand %p557_p3, %p551_p0 }
   0xb   :  { %561 = shalt.err (!%p558_p4)
}
   0xc   :  { %s609_s21 = smov 128   ;;  %s610_s22 = smov 8  }
   0xd   :  { %30 = dma.hbm_to_vmem [thread:$0]  %s728_s3, 4096, %s25_s19, [#allocation3], %s609_s21, %s609_s21, %s610_s22  }
   0xe   :  { %s611_s25 = smov [#allocation5]  }
   0xf   :  { %s36_s26 = sshll.u32 %s611_s25, 4  ;;  %s37_s26 = int_to_ptr.vmem [resolvable:$true] %s36_s26 }
  0x10   :  { %s570_s27 = scalar_lea.vmem %s37_s26, 4096  ;;  %p575_p6 = scmp.lt.s32.totalorder %s37_s26, %s37_s26 }
  0x11   :  { %p571_p5 = scmp.ne.s32.totalorder %s37_s26, %s570_s27  ;;  %p576_p7 = scmp.lt.s32.totalorder %s570_s27, %s570_s27 }
  0x13   :  { %p577_p8 = por %p576_p7, %p575_p6 }
  0x15   :  { %p578_p9 = pnand %p577_p8, %p571_p5 }
  0x17   :  { %581 = shalt.err (!%p578_p9)
}
  0x18   :  { %42 = dma.hbm_to_vmem [thread:$0]  %s729_s4, 4096, %s37_s26, [#allocation6], %s609_s21, %s609_s21, %s610_s22  }
  0x19   :  { %602 = dma.done.wait [#allocation3], 4096  }
  0x1a   :  { %603 = vsyncadd [#allocation3], 4294963200 }
  0x1b   :  { %604 = dma.done.wait [#allocation6], 4096  }
  0x1c   :  { %605 = vsyncadd [#allocation6], 4294963200  ;;  %v612_v0 = vmov 2   ;;  %v613_v1 = vmov 0   ;;  %v52_v2 = vld [vmem:[%s725_s0] sm:$0xff]  ;;  %v128_v3 = vld [vmem:[#allocation2 + $0xf8] sm:$0xff] }
  0x1d   :  { %526 = vset.pattern.permute.xlu1 %v612_v0  ;;  %524 = vset.pattern.permute.xlu0 %v613_v1  ;;  %v112_v4 = vld [vmem:[#allocation2 + $0x78] sm:$0xff]  ;;  %v127_v5 = vld [vmem:[#allocation2 + $0xf0] sm:$0xff]  ;;  %v614_v7 = vmov 3   ;;  %v615_v8 = vmov 1   ;;  %v126_v9 = vld [vmem:[#allocation2 + $0xe8] sm:$0xff]  ;;  %v616_v24 = vmov 4  }
  0x1e   :  { %74 = vperm.xlu1 %526, %v52_v2   ;;  %54 = vperm.xlu0 %524, %v52_v2   ;;  %v111_v6 = vld [vmem:[#allocation2 + $0x70] sm:$0xff]  ;;  %v110_v10 = vld [vmem:[#allocation2 + $0x68] sm:$0xff]  ;;  %v312_v11 = vld [vmem:[%s727_s2] sm:$0xff] }
  0x1f   :  { %442 = vmatprep.subr.mxu0 %v128_v3  ;;  %v125_v12 = vld [vmem:[#allocation2 + $0xe0] sm:$0xff]  ;;  %v124_v14 = vld [vmem:[#allocation2 + $0xd8] sm:$0xff]  ;;  %v123_v16 = vld [vmem:[#allocation2 + $0xd0] sm:$0xff] }
  0x20   :  { %443 = vmatpush3.msra.mxu0 %v112_v4  ;;  %v109_v13 = vld [vmem:[#allocation2 + $0x60] sm:$0xff]  ;;  %v108_v15 = vld [vmem:[#allocation2 + $0x58] sm:$0xff]  ;;  %v107_v17 = vld [vmem:[#allocation2 + $0x50] sm:$0xff] }
  0x21   :  { %444 = vmatprep.subr.mxu0 %v127_v5  ;;  %v122_v18 = vld [vmem:[#allocation2 + $0xc8] sm:$0xff]  ;;  %v121_v20 = vld [vmem:[#allocation2 + $0xc0] sm:$0xff]  ;;  %v120_v22 = vld [vmem:[#allocation2 + $0xb8] sm:$0xff]  ;;  %v49_v5 = vlaneseq }
  0x22   :  { %527 = vset.pattern.permute.xlu1 %v614_v7  ;;  %525 = vset.pattern.permute.xlu0 %v615_v8  ;;  %v106_v19 = vld [vmem:[#allocation2 + $0x48] sm:$0xff]  ;;  %v105_v21 = vld [vmem:[#allocation2 + $0x40] sm:$0xff]  ;;  %v230_v23 = vld [vmem:[#allocation5 + $0xf8] sm:$0xff] }
  0x23   :  { %85 = vperm.xlu1 %527, %v52_v2   ;;  %63 = vperm.xlu0 %525, %v52_v2   ;;  %v104_v25 = vld [vmem:[#allocation2 + $0x38] sm:$0xff]  ;;  %v119_v27 = vld [vmem:[#allocation2 + $0xb0] sm:$0xff]  ;;  %v118_v30 = vld [vmem:[#allocation2 + $0xa8] sm:$0xff] }
  0x24   :  { %445 = vmatpush3.msra.mxu0 %v111_v6  ;;  %v214_v26 = vld [vmem:[#allocation5 + $0x78] sm:$0xff]  ;;  %v229_v28 = vld [vmem:[#allocation5 + $0xf0] sm:$0xff]  ;;  %477 = vmatprep.subr.mxu1 %v230_v23  ;;  %v102_v31 = vld [vmem:[#allocation2 + $0x28] sm:$0xff]  ;;  %v664_v6 = vand.u32 127, %v49_v5 }
  0x25   :  { %446 = vmatprep.subr.mxu0 %v126_v9  ;;  %v103_v29 = vld [vmem:[#allocation2 + $0x30] sm:$0xff]  ;;  %478 = vmatpush3.xpose.msra.mxu1 %v214_v26  ;;  %v117_v33 = vld [vmem:[#allocation2 + $0xa0] sm:$0xff]  ;;  %v228_v34 = vld [vmem:[#allocation5 + $0xe8] sm:$0xff] }
  0x26   :  { %447 = vmatpush3.msra.mxu0 %v110_v10  ;;  %479 = vmatprep.subr.mxu1 %v229_v28  ;;  %v213_v32 = vld [vmem:[#allocation5 + $0x70] sm:$0xff]  ;;  %v101_v35 = vld [vmem:[#allocation2 + $0x20] sm:$0xff]  ;;  %v116_v36 = vld [vmem:[#allocation2 + $0x98] sm:$0xff] }
  0x27   :  { %528 = vset.pattern.permute.xlu1 %v613_v1  ;;  %323 = vperm.xlu0 %525, %v312_v11   ;;  %v100_v37 = vld [vmem:[#allocation2 + $0x18] sm:$0xff]  ;;  %v212_v38 = vld [vmem:[#allocation5 + $0x68] sm:$0xff]  ;;  %v115_v39 = vld [vmem:[#allocation2 + $0x90] sm:$0xff] }
  0x28   :  { %314 = vperm.xlu1 %528, %v312_v11   ;;  %448 = vmatprep.subr.mxu0 %v125_v12  ;;  %v227_v40 = vld [vmem:[#allocation5 + $0xe0] sm:$0xff]  ;;  %v99_v41 = vld [vmem:[#allocation2 + $0x10] sm:$0xff]  ;;  %v114_v42 = vld [vmem:[#allocation2 + $0x88] sm:$0xff]  ;;  %v617_v12 = vmov 0.0  }
  0x29   :  { %449 = vmatpush3.msra.mxu0 %v109_v13  ;;  %480 = vmatpush3.xpose.msra.mxu1 %v213_v32  ;;  %v98_v43 = vld [vmem:[#allocation2 + $0x8] sm:$0xff]  ;;  %v211_v44 = vld [vmem:[#allocation5 + $0x60] sm:$0xff]  ;;  %v226_v46 = vld [vmem:[#allocation5 + $0xd8] sm:$0xff] }
  0x2a   :  { %450 = vmatprep.subr.mxu0 %v124_v14  ;;  %481 = vmatprep.subr.mxu1 %v228_v34  ;;  %v113_v45 = vld [vmem:[#allocation2 + $0x80] sm:$0xff]  ;;  %v210_v48 = vld [vmem:[#allocation5 + $0x58] sm:$0xff]  ;;  %v225_v49 = vld [vmem:[#allocation5 + $0xd0] sm:$0xff] }
  0x2b   :  { %530 = vset.pattern.permute.xlu0 %v614_v7  ;;  %451 = vmatpush3.msra.mxu0 %v108_v15  ;;  %v97_v47 = vld [vmem:[#allocation2] sm:$0xff]  ;;  %v209_v50 = vld [vmem:[#allocation5 + $0x50] sm:$0xff]  ;;  %v224_v51 = vld [vmem:[#allocation5 + $0xc8] sm:$0xff]  ;;  %v667_v7 = vadd.s32 128, %v664_v6 }
  0x2c   :  { %529 = vset.pattern.permute.xlu1 %v612_v0  ;;  %345 = vperm.xlu0 %530, %v312_v11   ;;  %v208_v52 = vld [vmem:[#allocation5 + $0x48] sm:$0xff]  ;;  %v223_v53 = vld [vmem:[#allocation5 + $0xc0] sm:$0xff]  ;;  %v222_v55 = vld [vmem:[#allocation5 + $0xb8] sm:$0xff] }
  0x2d   :  { %334 = vperm.xlu1 %529, %v312_v11   ;;  %452 = vmatprep.subr.mxu0 %v123_v16  ;;  %v207_v54 = vld [vmem:[#allocation5 + $0x40] sm:$0xff]  ;;  %v206_v56 = vld [vmem:[#allocation5 + $0x38] sm:$0xff]  ;;  %v221_v57 = vld [vmem:[#allocation5 + $0xb0] sm:$0xff] }
  0x2e   :  { %453 = vmatpush3.msra.mxu0 %v107_v17  ;;  %482 = vmatpush3.xpose.msra.mxu1 %v212_v38  ;;  %v205_v58 = vld [vmem:[#allocation5 + $0x30] sm:$0xff]  ;;  %v220_v59 = vld [vmem:[#allocation5 + $0xa8] sm:$0xff]  ;;  %v219_v61 = vld [vmem:[#allocation5 + $0xa0] sm:$0xff] }
  0x2f   :  { %454 = vmatprep.subr.mxu0 %v122_v18  ;;  %483 = vmatprep.subr.mxu1 %v227_v40  ;;  %v204_v60 = vld [vmem:[#allocation5 + $0x28] sm:$0xff]  ;;  %v203_v62 = vld [vmem:[#allocation5 + $0x20] sm:$0xff]  ;;  %v218_v63 = vld [vmem:[#allocation5 + $0x98] sm:$0xff] }
  0x30   :  { %455 = vmatpush3.msra.mxu0 %v106_v19  ;;  %533 = vset.pattern.permute.xlu0 %v616_v24  ;;  %v202_v0 = vld [vmem:[#allocation5 + $0x18] sm:$0xff]  ;;  %v201_v2 = vld [vmem:[#allocation5 + $0x10] sm:$0xff]  ;;  %v216_v3 = vld [vmem:[#allocation5 + $0x88] sm:$0xff] }
  0x31   :  { %531 = vset.pattern.permute.xlu1 %v616_v24  ;;  %456 = vmatprep.subr.mxu0 %v121_v20  ;;  %v200_v4 = vld [vmem:[#allocation5 + $0x8] sm:$0xff] }
  0x32   :  { %356 = vperm.xlu1 %531, %v312_v11   ;;  %457 = vmatpush3.msra.mxu0 %v105_v21 }
  0x33   :  { %458 = vmatprep.subr.mxu0 %v120_v22  ;;  %484 = vmatpush3.xpose.msra.mxu1 %v211_v44 }
  0x34   :  { %459 = vmatpush3.msra.mxu0 %v104_v25  ;;  %485 = vmatprep.subr.mxu1 %v226_v46 }
  0x35   :  { %460 = vmatprep.subr.mxu0 %v119_v27 }
  0x36   :  { %461 = vmatpush3.msra.mxu0 %v103_v29  ;;  %532 = vset.pattern.permute.xlu1 %v613_v1  ;;  %v217_v1 = vld [vmem:[#allocation5 + $0x90] sm:$0xff]  ;;  %v215_v29 = vld [vmem:[#allocation5 + $0x80] sm:$0xff] }
  0x37   :  { %462 = vmatprep.subr.mxu0 %v118_v30  ;;  %486 = vmatpush3.xpose.msra.mxu1 %v210_v48  ;;  %v199_v30 = vld [vmem:[#allocation5] sm:$0xff] }
  0x38   :  { %463 = vmatpush3.msra.mxu0 %v102_v31  ;;  %487 = vmatprep.subr.mxu1 %v225_v49  ;;  %v302_v31 = vld [vmem:[%s726_s1] sm:$0xff]  ;;  %s618_s1 = smov [#allocation7]  }
  0x39   :  { %464 = vmatprep.subr.mxu0 %v117_v33  ;;  %304 = vperm.xlu1 %532, %v302_v31   ;;  %s412_s7 = sshll.u32 %s618_s1, 4  ;;  %s413_s7 = int_to_ptr.vmem [resolvable:$true] %s412_s7 }
  0x3a   :  { %465 = vmatpush3.msra.mxu0 %v101_v35  ;;  %s582_s9 = scalar_lea.vmem %s413_s7, 16  ;;  %s586_s10 = scalar_lea.vmem %s413_s7, 32 }
  0x3b   :  { %466 = vmatprep.subr.mxu0 %v116_v36  ;;  %488 = vmatpush3.xpose.msra.mxu1 %v209_v50  ;;  %p583_p10 = scmp.ne.s32.totalorder %s413_s7, %s582_s9  ;;  %p587_p11 = scmp.lt.s32.totalorder %s413_s7, %s413_s7 }
  0x3c   :  { %467 = vmatpush3.msra.mxu0 %v100_v37  ;;  %489 = vmatprep.subr.mxu1 %v224_v51  ;;  %p588_p12 = scmp.lt.s32.totalorder %s586_s10, %s582_s9 }
  0x3d   :  { %468 = vmatprep.subr.mxu0 %v115_v39 }
  0x3e   :  { %469 = vmatpush3.msra.mxu0 %v99_v41  ;;  %p589_p13 = por %p588_p12, %p587_p11 }
  0x3f   :  { %470 = vmatprep.subr.mxu0 %v114_v42  ;;  %490 = vmatpush3.xpose.msra.mxu1 %v208_v52 }
  0x40   :  { %471 = vmatpush3.msra.mxu0 %v98_v43  ;;  %491 = vmatprep.subr.mxu1 %v223_v53  ;;  %p590_p0 = pnand %p589_p13, %p583_p10 }
  0x41   :  { %472 = vmatprep.subr.mxu0 %v113_v45 }
  0x42   :  { %473 = vmatpush3.msra.mxu0 %v97_v47 }
  0x43   :  { %492 = vmatpush3.xpose.msra.mxu1 %v207_v54 }
  0x44   :  { %493 = vmatprep.subr.mxu1 %v222_v55 }
  0x47   :  { %494 = vmatpush3.xpose.msra.mxu1 %v206_v56 }
  0x48   :  { %495 = vmatprep.subr.mxu1 %v221_v57 }
  0x4b   :  { %496 = vmatpush3.xpose.msra.mxu1 %v205_v58 }
  0x4c   :  { %497 = vmatprep.subr.mxu1 %v220_v59 }
  0x4f   :  { %498 = vmatpush3.xpose.msra.mxu1 %v204_v60 }
  0x50   :  { %499 = vmatprep.subr.mxu1 %v219_v61 }
  0x53   :  { %500 = vmatpush3.xpose.msra.mxu1 %v203_v62 }
  0x54   :  { %501 = vmatprep.subr.mxu1 %v218_v63 }
  0x57   :  { %502 = vmatpush3.xpose.msra.mxu1 %v202_v0 }
  0x58   :  { %503 = vmatprep.subr.mxu1 %v217_v1 }
  0x5b   :  { %504 = vmatpush3.xpose.msra.mxu1 %v201_v2 }
  0x5c   :  { %505 = vmatprep.subr.mxu1 %v216_v3 }
  0x5f   :  { %506 = vmatpush3.xpose.msra.mxu1 %v200_v4 }
  0x60   :  { %507 = vmatprep.subr.mxu1 %v215_v29 }
  0x63   :  { %508 = vmatpush3.xpose.msra.mxu1 %v199_v30 }
  0x99   :  { %v55_v8 = vpop.permute.xlu0 %54  ;;  %v75_v9 = vpop.permute.xlu1 %74 }
  0x9a   :  { %vm56_vm0 = vcmp.eq.s32.totalorder %v664_v6, %v55_v8  ;;  %vm57_vm1 = vcmp.eq.s32.totalorder %v667_v7, %v55_v8  ;;  %vm76_vm2 = vcmp.eq.s32.totalorder %v664_v6, %v75_v9  ;;  %vm77_vm3 = vcmp.eq.s32.totalorder %v667_v7, %v75_v9 }
  0x9b   :  { %v422_v13 = vsel %vm56_vm0, 1.0, %v617_v12  ;;  %v423_v14 = vsel %vm57_vm1, 1.0, %v617_v12  ;;  %v426_v19 = vsel %vm76_vm2, 1.0, %v617_v12  ;;  %v427_v20 = vsel %vm77_vm3, 1.0, %v617_v12 }
  0x9e   :  { %v64_v10 = vpop.permute.xlu0 %63  ;;  %v86_v11 = vpop.permute.xlu1 %85 }
  0x9f   :  { %vm65_vm4 = vcmp.eq.s32.totalorder %v664_v6, %v64_v10  ;;  %vm66_vm5 = vcmp.eq.s32.totalorder %v667_v7, %v64_v10  ;;  %vm87_vm6 = vcmp.eq.s32.totalorder %v664_v6, %v86_v11  ;;  %vm88_vm7 = vcmp.eq.s32.totalorder %v667_v7, %v86_v11 }
  0xa0   :  { %v424_v15 = vsel %vm65_vm4, 1.0, %v617_v12  ;;  %v425_v16 = vsel %vm66_vm5, 1.0, %v617_v12  ;;  %v428_v21 = vsel %vm87_vm6, 1.0, %v617_v12  ;;  %v429_v22 = vsel %vm88_vm7, 1.0, %v617_v12 }
  0xa1   :  { %v71_v17 = vadd.f32 %v424_v15, %v422_v13  ;;  %v72_v18 = vadd.f32 %v425_v16, %v423_v14  ;;  %vm404_vm4 = vcmask 0  }
  0xa2   :  { %v324_v47 = vpop.permute.xlu0 %323 }
  0xa3   :  { %v82_v23 = vadd.f32 %v426_v19, %v71_v17  ;;  %v83_v24 = vadd.f32 %v427_v20, %v72_v18  ;;  %v315_v43 = vpop.permute.xlu1 %314  ;;  %vm325_vm8 = vcmp.eq.s32.totalorder %v664_v6, %v324_v47  ;;  %vm326_vm9 = vcmp.eq.s32.totalorder %v667_v7, %v324_v47 }
  0xa4   :  { %vm316_vm10 = vcmp.eq.s32.totalorder %v664_v6, %v315_v43  ;;  %vm317_vm11 = vcmp.eq.s32.totalorder %v667_v7, %v315_v43  ;;  %v434_v50 = vsel %vm325_vm8, 1.0, %v617_v12  ;;  %v435_v51 = vsel %vm326_vm9, 1.0, %v617_v12 }
  0xa5   :  { %v93_v25 = vadd.f32 %v428_v21, %v82_v23  ;;  %v94_v26 = vadd.f32 %v429_v22, %v83_v24  ;;  %v432_v52 = vsel %vm316_vm10, 1.0, %v617_v12  ;;  %v433_v53 = vsel %vm317_vm11, 1.0, %v617_v12 }
  0xa6   :  { %v331_v58 = vadd.f32 %v434_v50, %v432_v52  ;;  %v332_v59 = vadd.f32 %v435_v51, %v433_v53 }
  0xa7   :  { %v96_v27 = vmul.f32 0.25, %v94_v26  ;;  %v95_v28 = vmul.f32 0.25, %v93_v25  ;;  %v346_v54 = vpop.permute.xlu0 %345 }
  0xa8   :  { %v335_v49 = vpop.permute.xlu1 %334  ;;  %vm347_vm14 = vcmp.eq.s32.totalorder %v664_v6, %v346_v54  ;;  %vm348_vm15 = vcmp.eq.s32.totalorder %v667_v7, %v346_v54 }
  0xa9   :  { %193 = vmatprep.mubr.f32.mxu0 %v96_v27  ;;  %vm336_vm12 = vcmp.eq.s32.totalorder %v664_v6, %v335_v49  ;;  %vm337_vm13 = vcmp.eq.s32.totalorder %v667_v7, %v335_v49  ;;  %v438_v63 = vsel %vm347_vm14, 1.0, %v617_v12  ;;  %v439_v0 = vsel %vm348_vm15, 1.0, %v617_v12 }
  0xaa   :  { %194 = vmatmul.mubr.f32.vlgmr.msra.gmra.mxu0 %v95_v28  ;;  %v436_v56 = vsel %vm336_vm12, 1.0, %v617_v12  ;;  %v437_v57 = vsel %vm337_vm13, 1.0, %v617_v12 }
  0xab   :  { %v342_v60 = vadd.f32 %v436_v56, %v331_v58  ;;  %v343_v61 = vadd.f32 %v437_v57, %v332_v59 }
  0xad   :  { %v357_v55 = vpop.permute.xlu1 %356  ;;  %v353_v5 = vadd.f32 %v438_v63, %v342_v60  ;;  %v354_v8 = vadd.f32 %v439_v0, %v343_v61 }
  0xae   :  { %vm358_vm0 = vcmp.eq.s32.totalorder %v664_v6, %v357_v55  ;;  %vm359_vm1 = vcmp.eq.s32.totalorder %v667_v7, %v357_v55 }
  0xaf   :  { %v440_v13 = vsel %vm358_vm0, 1.0, %v617_v12  ;;  %v441_v14 = vsel %vm359_vm1, 1.0, %v617_v12 }
  0xb0   :  { %v364_v18 = vadd.f32 %v440_v13, %v353_v5  ;;  %v365_v19 = vadd.f32 %v441_v14, %v354_v8 }
  0xb4   :  { %v305_v62 = vpop.permute.xlu1 %304 }
  0xb5   :  { %vm306_vm2 = vcmp.eq.s32.totalorder %v664_v6, %v305_v62  ;;  %vm307_vm3 = vcmp.eq.s32.totalorder %v667_v7, %v305_v62 }
  0xb6   :  { %v430_v15 = vsel %vm306_vm2, 1.0, %v617_v12  ;;  %v431_v6 = vsel %vm307_vm3, 1.0, %v617_v12 }
 0x16a   :  { %v474_v32 = vpop.f32.mrf.mxu0 }
 0x16c   :  { %v475_v33 = vpop.f32.mrf.mxu0 }
 0x16d   :  { %v476_v34 = vadd.f32 %v475_v33, %v474_v32 }
 0x16f   :  { %509 = vmatprep.mubr.f32.mxu1 %v476_v34 }
 0x170   :  { %510 = vmatmul.mubr.f32.vlgmr.msra.gmra.mxu1 %v476_v34 }
 0x230   :  { %v688_v35 = vpop.f32.mrf.mxu1 }
 0x231   :  { %v368_v36 = vand.u32 2147483647, %v688_v35  ;;  %v366_v2 = vmax.f32 %v688_v35, 0.0 }
 0x232   :  { %v691_v37 = vpop.f32.mrf.mxu1 }
 0x233   :  { %v370_v38 = vsub.f32 0.0, %v368_v36  ;;  %v369_v39 = vand.u32 2147483647, %v691_v37  ;;  %v367_v10 = vmax.f32 %v691_v37, 0.0 }
 0x235   :  { %v372_v40 = vmul.f32 1.442695, %v370_v38  ;;  %v371_v41 = vsub.f32 0.0, %v369_v39 }
 0x237   :  { %534 = vpow2.f32 %v372_v40  ;;  %v374_v42 = vmul.f32 1.442695, %v371_v41 }
 0x239   :  { %536 = vpow2.f32 %v374_v42 }
 0x244   :  { %v535_v44 = vpop.eup %534 }
 0x245   :  { %v376_v45 = vadd.f32 1.0, %v535_v44 }
 0x246   :  { %v537_v46 = vpop.eup %536 }
 0x247   :  { %538 = vlog2.f32 %v376_v45  ;;  %v377_v48 = vadd.f32 1.0, %v537_v46 }
 0x249   :  { %540 = vlog2.f32 %v377_v48 }
 0x254   :  { %v539_v1 = vpop.eup %538 }
 0x255   :  { %v379_v3 = vmul.f32 0.6931472, %v539_v1 }
 0x256   :  { %v541_v4 = vpop.eup %540 }
 0x257   :  { %v382_v9 = vadd.f32 %v379_v3, %v366_v2  ;;  %v381_v11 = vmul.f32 0.6931472, %v541_v4 }
 0x259   :  { %v384_v16 = vsub.f32 %v382_v9, %v688_v35  ;;  %v383_v17 = vadd.f32 %v381_v11, %v367_v10  ;;  %v388_v23 = vmul.f32 %v382_v9, %v364_v18 }
 0x25b   :  { %v385_v20 = vsub.f32 %v383_v17, %v691_v37  ;;  %v386_v21 = vmul.f32 %v430_v15, %v384_v16  ;;  %v389_v24 = vmul.f32 %v383_v17, %v365_v19 }
 0x25d   :  { %v387_v22 = vmul.f32 %v431_v6, %v385_v20  ;;  %v390_v7 = vadd.f32 %v388_v23, %v386_v21 }
 0x25f   :  { %v391_v25 = vadd.f32 %v389_v24, %v387_v22 }
 0x261   :  { %v392_v26 = vadd.f32 %v391_v25, %v390_v7 }
 0x263   :  { %393 = vadd.xlane.f32.xlu0 %v392_v26 }
 0x2ec   :  { %v394_v27 = vpop.xlane.xlu0 %393 }
 0x2ed   :  { %v395_v28 = vrot.slane %v394_v27, 4 }
 0x2ef   :  { %v396_v29 = vadd.f32 %v395_v28, %v394_v27 }
 0x2f1   :  { %v397_v30 = vrot.slane %v396_v29, 2 }
 0x2f3   :  { %v398_v31 = vadd.f32 %v397_v30, %v396_v29 }
 0x2f5   :  { %v399_v32 = vrot.slane %v398_v31, 1 }
 0x2f7   :  { %v400_v33 = vadd.f32 %v399_v32, %v398_v31 }
 0x2f9   :  { %511 = vpush %v400_v33 }
 0x32a   :  { %s512_s8 = spop %511 }
 0x32b   :  { %v402_v12 = vstv %s512_s8 }
 0x32c   :  { %v403_v34 = vmul.f32 0.125, %v402_v12 }
 0x32e   :  { %405 = vst.msk [vmem:[#allocation7] sm:$0x1] %vm404_vm4, %v403_v34 }
 0x32f   :  { %593 = shalt.err (!%p590_p0)
}
 0x330   :  { %415 = dma.vmem_to_hbm [thread:$0]  %s413_s7, 16, %s730_s5, [#allocation4]  }
 0x331   :  { %606 = dma.done.wait [#allocation4], 16  }
 0x332   :  { %607 = vsyncadd [#allocation4], 4294967280 }
 0x333   :  { %419 = vsyncpa [#allocation3], 1 }
 0x334   :  { %420 = vsyncpa [#allocation6], 1 }
 0x335   :  { %421 = vsyncpa [#allocation4], 1 }

</bundles_post_ra>
